<compile_context>
chip_gen: v5e
topology: v5e:2x2
jax: 0.10.0
libtpu: 0.0.40
codegen_flags: <defaults>
</compile_context>

<pallas_src>
import jax
import jax.numpy as jnp
from jax import lax
from jax.experimental import pallas as pl
from jax.experimental.pallas import tpu as pltpu

K = 3                                      # every (de)conv is 3x3, stride 1, padding 0
_ENC_CH = [(1, 16), (16, 32), (32, 64)]    # nn.Conv2d(in, out, 3)
_DEC_CH = [(64, 32), (32, 16), (16, 1)]    # nn.ConvTranspose2d(in, out, 3)
_MM_DTYPE = jnp.bfloat16                   # matmul-operand dtype (accumulation is f32)

_ROLL_IS_NP = [None]                       # pltpu.roll direction, probed once on-device


def _next_pow2(n):
    p = 1
    while p < n:
        p *= 2
    return p


def _ensure_roll_probe():
    """Probe pltpu.roll's rotation convention once (np.roll-style vs opposite)."""
    if _ROLL_IS_NP[0] is None:
        def probe(x_ref, o_ref):
            o_ref[...] = pltpu.roll(x_ref[...], 1, 1)

        x = jnp.arange(128, dtype=jnp.float32).reshape(1, 128)
        vmem = pl.BlockSpec(memory_space=pltpu.MemorySpace.VMEM)
        y = pl.pallas_call(
            probe,
            out_shape=jax.ShapeDtypeStruct((1, 128), jnp.float32),
            in_specs=[vmem], out_specs=vmem,
        )(x)
        _ROLL_IS_NP[0] = bool(y[0, 0] > 64.0)   # np.roll convention -> y[0,0] == 127
    return _ROLL_IS_NP[0]


# ---------------------------------------------------------------------------
# Kernel (built per static image geometry).
# ---------------------------------------------------------------------------
def _make_kernel(H, W, HC, WC, roll_is_np):
    L = HC * WC
    P = K - 1                                   # = 2

    def shift(x, delta):
        """v[:, i] = x[:, (i + delta) % L] for a static integer delta (any sign)."""
        d = delta % L
        if d == 0:
            return x
        amt = (L - d) if roll_is_np else d
        return pltpu.roll(x, amt, axis=1)

    tap_shifts = [dy * WC + dx for dy in range(K) for dx in range(K)]

    def conv3x3_relu(h, w_ref, b_ref, cin, cout):
        """Valid 3x3 cross-correlation + bias + ReLU on the flat canvas.

        h: (cin, L) f32.  w_ref: (cout, 9*cin) bf16, columns in (ky, kx, ci) order.
        b_ref: (cout, 1) f32.  Returns (cout, L) f32 (valid region anchored at (0,0),
        other lanes garbage that later valid outputs never read).
        """
        if cin == 1:
            # Degenerate K=1-channel contraction: VPU broadcast FMAs (skip the MXU,
            # and skip the unaligned single-sublane im2col concat).  Operands are
            # still rounded to the matmul dtype so numerics match the other layers.
            hq = h.astype(_MM_DTYPE).astype(jnp.float32)
            w32 = w_ref[...].astype(jnp.float32)                  # (cout, 9)
            acc = jnp.zeros((cout, L), jnp.float32)
            for t, s in enumerate(tap_shifts):
                acc = acc + w32[:, t:t + 1] * shift(hq, s)
        else:
            # im2col: 9 rolled copies stacked on sublanes -> ONE MXU matmul,
            # M=cout, K=9*cin (144..576), N=L (lane-dense, multiple of 128).
            xcat = jnp.concatenate([shift(h, s) for s in tap_shifts], axis=0)
            acc = jnp.dot(w_ref[...], xcat.astype(_MM_DTYPE),
                          preferred_element_type=jnp.float32)
        return jnp.maximum(acc + b_ref[...], 0.0)

    def pool_unpool(h, lane):
        """Fused MaxPool2d(2, return_indices) + MaxUnpool2d(2): keep each 2x2
        window's max (first in row-major order on ties) in place, zero the rest."""
        x_even = (lane & 1) == 0
        y_even = (lane & WC) == 0                                  # WC is a power of 2
        wpart = jnp.where(x_even, shift(h, 1), shift(h, -1))       # same-row partner
        rp = jnp.maximum(h, wpart)                                 # this row's pair max
        orp = jnp.where(y_even, shift(rp, WC), shift(rp, -WC))     # other row's pair max
        wmax = jnp.maximum(rp, orp)                                # full 2x2 window max
        prev = jnp.where(y_even, jnp.full_like(rp, -jnp.inf), shift(rp, -WC))
        first_in_row = (h == rp) & (x_even | (wpart != rp))
        is_win = (h == wmax) & first_in_row & (prev != wmax)
        return jnp.where(is_win, h, 0.0)

    def pad2(h, lane, Hv, Wv):
        """ConvTranspose2d(3,1,0) == zero-pad by K-1 on every side + valid conv with
        pre-flipped/channel-swapped weights.  Shift the valid (Hv, Wv) block from
        canvas offset (0,0) to (2,2) and zero every other lane."""
        xcol = lane & (WC - 1)
        interior = ((lane >= P * WC) & (lane < (P + Hv) * WC) &
                    (xcol >= P) & (xcol < P + Wv))
        return jnp.where(interior, shift(h, -(P * WC + P)), 0.0)

    def kernel(x_ref, *refs):
        o_ref = refs[-1]
        wb = refs[:-1]                                             # w0, b0, ..., w5, b5
        lane = lax.broadcasted_iota(jnp.int32, (1, L), 1)
        h = x_ref[0]                                               # (1, L) f32 canvas
        Hv, Wv = H, W                                              # current valid extent
        for li, (cin, cout) in enumerate(_ENC_CH + _DEC_CH):
            w_ref, b_ref = wb[2 * li], wb[2 * li + 1]
            if li >= len(_ENC_CH):                                 # decoder layer
                h = pad2(h, lane, Hv, Wv)
                Hv, Wv = Hv + 2 * P, Wv + 2 * P
            h = conv3x3_relu(h, w_ref, b_ref, cin, cout)
            Hv, Wv = Hv - P, Wv - P
            if li == len(_ENC_CH) - 1:                             # encoder -> decoder
                h = pool_unpool(h, lane)
        o_ref[0] = h                                               # (1, L) lane-dense store

    return kernel


# ---------------------------------------------------------------------------
# Parameters (PyTorch layouts) and one-time kernel-layout preparation.
# ---------------------------------------------------------------------------
def init_params(key):
    """Deterministic PyTorch-like U(-1/sqrt(fan), 1/sqrt(fan)) init, native layouts:
    Conv2d (O, I, kH, kW); ConvTranspose2d (I, O, kH, kW)."""
    def uni(k, shape, fan):
        b = 1.0 / (fan ** 0.5)
        return jax.random.uniform(k, shape, jnp.float32, -b, b)

    keys = jax.random.split(key, 2 * (len(_ENC_CH) + len(_DEC_CH)))
    raw = {"enc": [], "dec": []}
    ki = 0
    for cin, cout in _ENC_CH:
        fan = cin * K * K
        raw["enc"].append((uni(keys[ki], (cout, cin, K, K), fan),
                           uni(keys[ki + 1], (cout,), fan)))
        ki += 2
    for cin, cout in _DEC_CH:
        fan = cout * K * K
        raw["dec"].append((uni(keys[ki], (cin, cout, K, K), fan),
                           uni(keys[ki + 1], (cout,), fan)))
        ki += 2
    return raw


def prep_kernel_params(raw):
    """Hoist all weight relayouts out of the forward pass: (cout, 9*cin) in
    (ky, kx, ci) column order, cast to the matmul dtype; ConvTranspose weights are
    additionally flipped spatially and channel-swapped.  Biases become (cout, 1)."""
    flat = []
    for w_oihw, b in raw["enc"]:
        cout, cin = w_oihw.shape[0], w_oihw.shape[1]
        w = jnp.transpose(w_oihw, (0, 2, 3, 1)).reshape(cout, K * K * cin)
        flat += [w.astype(_MM_DTYPE), b.reshape(cout, 1).astype(jnp.float32)]
    for w_iokk, b in raw["dec"]:
        cin, cout = w_iokk.shape[0], w_iokk.shape[1]
        w_eff = jnp.transpose(jnp.flip(w_iokk, axis=(2, 3)), (1, 2, 3, 0))
        flat += [w_eff.reshape(cout, K * K * cin).astype(_MM_DTYPE),
                 b.reshape(cout, 1).astype(jnp.float32)]
    return flat


# ---------------------------------------------------------------------------
# Forward wrapper.
# ---------------------------------------------------------------------------
@jax.jit
def _forward_jit(x_nchw, *flat_params):
    N, C, H, W = x_nchw.shape
    assert C == 1
    # Canvas geometry: WC = power of 2 >= largest padded width (W + 2); HC rounded so
    # L = HC*WC is a multiple of 128 (lane-dense matmul N / unmasked stores).
    WC = _next_pow2(W + K - 1)
    unit = max(1, 128 // WC)
    HC = ((H + K - 1 + unit - 1) // unit) * unit
    L = HC * WC

    x = x_nchw.reshape(N, H, W)
    x = jnp.pad(x, ((0, 0), (0, HC - H), (0, WC - W)))
    x_canvas = x.reshape(N, 1, L)

    kernel = _make_kernel(H, W, HC, WC, _ROLL_IS_NP[0])
    canvas_spec = pl.BlockSpec((1, 1, L), lambda b: (b, 0, 0))
    param_specs = [pl.BlockSpec(p.shape, lambda b: (0, 0)) for p in flat_params]

    out_canvas = pl.pallas_call(
        kernel,
        grid=(N,),
        out_shape=jax.ShapeDtypeStruct((N, 1, L), jnp.float32),
        in_specs=[canvas_spec] + param_specs,
        out_specs=pl.BlockSpec((1, 1, L), lambda b: (b, 0, 0)),
        compiler_params=pltpu.CompilerParams(dimension_semantics=("parallel",)),
    )(x_canvas, *flat_params)

    out = out_canvas.reshape(N, HC, WC)[:, :H, :W]
    return out.reshape(N, 1, H, W)


def autoencoder_forward(x_nchw, flat_params):
    """x_nchw: (N, 1, H, W) float32; each image processed independently (identical
    semantics to the PyTorch module's batch-1 forward per image)."""
    _ensure_roll_probe()
    return _forward_jit(x_nchw, *flat_params)


# ---------------------------------------------------------------------------
# Pure-JAX/XLA reference of the PyTorch forward (for validation).
# ---------------------------------------------------------------------------
def reference_forward(x_nchw, raw, operand_dtype=jnp.float32):
    """operand_dtype=_MM_DTYPE reproduces the kernel's numerics (bf16 operands,
    f32 accumulation); float32 is the exact-precision reference.  Also returns the
    smallest positive top-2 gap of the pool windows (argmax tie sensitivity)."""
    dn = ("NCHW", "OIHW", "NCHW")

    def conv(x, w, pad):
        return lax.conv_general_dilated(
            x.astype(operand_dtype), w.astype(operand_dtype), (1, 1), pad,
            dimension_numbers=dn, precision=lax.Precision.HIGHEST,
            preferred_element_type=jnp.float32)

    x = x_nchw
    for w, b in raw["enc"]:
        x = jnp.maximum(conv(x, w, "VALID") + b.reshape(1, -1, 1, 1), 0.0)

    N, C, Hc, Wc = x.shape
    Hp, Wp = Hc // 2, Wc // 2
    xw = x.reshape(N, C, Hp, 2, Wp, 2).transpose(0, 1, 2, 4, 3, 5).reshape(N, C, Hp, Wp, 4)
    srt = jnp.sort(xw, axis=-1)
    pool_gap = jnp.min(jnp.where(srt[..., 3] > 0, srt[..., 3] - srt[..., 2], jnp.inf))
    idx = jnp.argmax(xw, axis=-1)          # first max in row-major window order
    keep = jax.nn.one_hot(idx, 4, dtype=x.dtype) * jnp.max(xw, axis=-1, keepdims=True)
    x = keep.reshape(N, C, Hp, Wp, 2, 2).transpose(0, 1, 2, 4, 3, 5).reshape(N, C, Hc, Wc)

    for w, b in raw["dec"]:
        w_eff = jnp.transpose(jnp.flip(w, axis=(2, 3)), (1, 0, 2, 3))  # OIHW, flipped
        x = jnp.maximum(conv(x, w_eff, [(K - 1, K - 1)] * 2) + b.reshape(1, -1, 1, 1), 0.0)
    return x, pool_gap


if __name__ == "__main__":
    key = jax.random.PRNGKey(0)
    pkey, xkey = jax.random.split(key)
    raw = init_params(pkey)
    flat = prep_kernel_params(raw)

    N, H, W = 2, 16, 16  # small spatial size consistent with the conv3x3*3 -> pool -> deconv3x3*3 stack
    # Mirror Autoencoder.resize(): (N, H, W, 1) sample -> NCHW float32.
    sample = jax.random.normal(xkey, (N, H, W, 1), dtype=jnp.float32)
    x_nchw = jnp.transpose(sample, (0, 3, 1, 2)).astype(jnp.float32)

    out = jax.block_until_ready(autoencoder_forward(x_nchw, flat))
    assert out.shape == (N, 1, H, W), out.shape
    assert bool(jnp.all(out >= 0.0))       # final ReLU

    # (1) Matched-precision reference (same bf16 operand rounding, f32 accumulation):
    #     differences are f32 summation-order noise only, so the check is tight —
    #     unless the max-pool argmax has a near-tie, where an ulp-level perturbation
    #     legally flips the selected index; then fall back to a drift bound.
    ref_mm, pool_gap = reference_forward(x_nchw, raw, operand_dtype=_MM_DTYPE)
    tol = 1e-3 if float(pool_gap) > 1e-5 else 3e-2
    err_mm = float(jnp.max(jnp.abs(out - ref_mm)))
    assert bool(jnp.allclose(out, ref_mm, atol=tol, rtol=tol)), (err_mm, tol)

    # (2) Full-f32 reference: bounds the end-to-end bf16-operand drift of the pipeline.
    ref_f32, _ = reference_forward(x_nchw, raw, operand_dtype=jnp.float32)
    err_f32 = float(jnp.max(jnp.abs(out - ref_f32)))
    assert bool(jnp.allclose(out, ref_f32, atol=1e-1, rtol=1e-1)), err_f32

    print("KERNEL_OK")
</pallas_src>

<mosaic_0001>
module attributes {stable_mosaic.version = 11 : i64} {
  func.func @probe(%arg0: memref<1x128xf32, #tpu.memory_space<vmem>>, %arg1: memref<1x128xf32, #tpu.memory_space<vmem>>) attributes {dimension_semantics = [], scalar_prefetch = 0 : i64, scratch_operands = 0 : i64, tpu.core_type = #tpu.core_type<tc>} {
    %c0 = arith.constant 0 : index
    %c0_0 = arith.constant 0 : index
    %0 = vector.load %arg0[%c0, %c0_0] : memref<1x128xf32, #tpu.memory_space<vmem>>, vector<1x128xf32>
    %c1_i32 = arith.constant 1 : i32
    %1 = tpu.dynamic_rotate %0 by %c1_i32 dim 1 : vector<1x128xf32>, i32 -> vector<1x128xf32>
    %c0_1 = arith.constant 0 : index
    %c0_2 = arith.constant 0 : index
    %2 = vector.load %arg1[%c0_1, %c0_2] : memref<1x128xf32, #tpu.memory_space<vmem>>, vector<1x128xf32>
    tpu.vector_store %arg1[%c0_1, %c0_2], %1 {strides = array<i32>} : memref<1x128xf32, #tpu.memory_space<vmem>>, vector<1x128xf32>,
    return
  }
}

</mosaic_0001>

<bundles_post_ra>
// kernel: tpu_custom_call.1
= control target key start
LH: loop header
LB: loop body
LE: loop exit
PB: predicated region body
PF: predicated region fallthrough
CT: control target
= control target key end

     0   :  { %6 = vsyncpa [#allocation3], 0  ;;  %s118_s0 = inlined_call_operand.hbm [shape: f32[1,128], index: 0, kind: input, shape index: {}]   ;;  %s119_s1 = inlined_call_operand.hbm [shape: f32[1,128], index: 1, kind: output, shape index: {}]  }
   0x1   :  { %7 = vsyncpa [#allocation4], 0  ;;  %s13_s8 = sshll.u32 %s118_s0, 4  ;;  %s99_s9 = smov [#allocation2]   ;;  %s14_s8 = int_to_ptr.hbm [resolvable:$true] %s13_s8 }
   0x2   :  { %s15_s10 = sshll.u32 %s99_s9, 4  ;;  %s16_s10 = int_to_ptr.vmem [resolvable:$true] %s15_s10 }
   0x3   :  { %18 = dma.hbm_to_vmem [thread:$0]  %s14_s8, 16, %s16_s10, [#allocation3]  }
   0x4   :  { %95 = dma.done.wait [#allocation3], 16  }
   0x5   :  { %96 = vsyncadd [#allocation3], 4294967280  ;;  %v23_v0 = vld [vmem:[#allocation2] sm:$0x1]  ;;  %s100_s11 = smov 1   ;;  %s101_s12 = smov [#allocation5]  }
   0x6   :  { %24 = vrot.lane.b32.xlu0 %v23_v0, %s100_s11  ;;  %s32_s13 = sshll.u32 %s101_s12, 4  ;;  %s34_s16 = sshll.u32 %s119_s1, 4  ;;  %s33_s13 = int_to_ptr.vmem [resolvable:$true] %s32_s13  ;;  %s35_s16 = int_to_ptr.hbm [resolvable:$true] %s34_s16 }
  0x78   :  { %v25_v1 = vpop.permute.xlu0 %24 }
  0x79   :  { %26 = vst [vmem:[#allocation5] sm:$0x1] %v25_v1 }
  0x7a   :  { %37 = dma.vmem_to_hbm [thread:$0]  %s33_s13, 16, %s35_s16, [#allocation4]  }
  0x7b   :  { %97 = dma.done.wait [#allocation4], 16  }
  0x7c   :  { %98 = vsyncadd [#allocation4], 4294967280 }
  0x7d   :  { %42 = vsyncpa [#allocation3], 1 }
  0x7e   :  { %43 = vsyncpa [#allocation4], 1 }

</bundles_post_ra>
